<compile_context>
chip_gen: v7x
topology: tpu7x:2x2x1
jax: 0.10.0
libtpu: 0.0.40
codegen_flags: <defaults>
</compile_context>

<pallas_src>
import jax
import jax.numpy as jnp
from jax.experimental import pallas as pl
from jax.experimental.pallas import tpu as pltpu

LANE = 128


def _round_up(x, m):
    return ((x + m - 1) // m) * m


# ---------------------------------------------------------------------------
# Pallas kernel: fused (fc1 @ fc2) linear + bias + ReLU on pooled activations
# ---------------------------------------------------------------------------
def fasttext_fused_mlp_kernel(p_ref, w_ref, b_ref, out_ref):
    # p_ref : (TB, D3)  bf16  pooled concat-embeddings (lane dim = full 3E)
    # w_ref : (D3, Cp)  bf16  W_eff = W1 @ W2, zero-padded to 128 lanes
    # b_ref : (1,  Cp)  f32   b_eff = b1 @ W2 + b2
    # out   : (TB, Cp)  f32   lane-dense
    o = jnp.dot(p_ref[...], w_ref[...],
                preferred_element_type=jnp.float32) + b_ref[...]
    out_ref[...] = jnp.maximum(o, 0.0)                     # F.relu, f32 epilogue


# ---------------------------------------------------------------------------
# One-time parameter preparation (hoisted out of the per-call path)
# ---------------------------------------------------------------------------
def prepare_params(params):
    emb_word = params["emb_word"]        # (V,  E) f32
    emb_bigram = params["emb_bigram"]    # (Vn, E) f32, row Vn-1 zero (padding_idx)
    emb_trigram = params["emb_trigram"]  # (Vn, E) f32
    w1, b1 = params["w1"], params["b1"]  # (3E, H), (1, H)
    w2, b2 = params["w2"], params["b2"]  # (H, C),  (1, C)

    D3 = w1.shape[0]
    C = w2.shape[1]
    Cp = _round_up(C, LANE)

    # Algebraic fusion (no nonlinearity between fc1 and fc2), done in f32 so the
    # hidden activation is never rounded; single bf16 cast of the fused weight.
    w_eff = w1.astype(jnp.float32) @ w2.astype(jnp.float32)            # (3E, C)
    b_eff = b1.astype(jnp.float32) @ w2.astype(jnp.float32) + b2       # (1,  C)

    w_eff_pad = jnp.zeros((D3, Cp), jnp.bfloat16).at[:, :C].set(w_eff.astype(jnp.bfloat16))
    b_eff_pad = jnp.zeros((1, Cp), jnp.float32).at[:, :C].set(b_eff.astype(jnp.float32))

    prepped = {"w_eff": w_eff_pad, "b_eff": b_eff_pad,
               "class_num": int(C), "d3": int(D3)}

    # Single bf16 lane-dense (V, 3E) table -> one gather instead of three + concat.
    # Valid only when all three tables share the same index space (as in the ref).
    if emb_word.shape[0] == emb_bigram.shape[0] == emb_trigram.shape[0]:
        prepped["emb_cat"] = jnp.concatenate(
            (emb_word, emb_bigram, emb_trigram), axis=-1).astype(jnp.bfloat16)
    else:
        prepped["emb_word"] = emb_word.astype(jnp.bfloat16)
        prepped["emb_bigram"] = emb_bigram.astype(jnp.bfloat16)
        prepped["emb_trigram"] = emb_trigram.astype(jnp.bfloat16)
    return prepped


# ---------------------------------------------------------------------------
# Forward
# ---------------------------------------------------------------------------
def fasttext_forward(x, prepped, *, small_batch_xla_threshold=0):
    """x: (B, S) int32 token ids. Returns (B, class_num) float32 logits."""
    w_eff = prepped["w_eff"]          # (D3, Cp) bf16
    b_eff = prepped["b_eff"]          # (1,  Cp) f32
    C = prepped["class_num"]
    D3 = prepped["d3"]
    Cp = w_eff.shape[1]

    # ---- glue: gather + mean pool (fused by XLA); kernel only sees (B, 3E) ----
    if "emb_cat" in prepped:
        emb = jnp.take(prepped["emb_cat"], x, axis=0)                  # (B, S, 3E) bf16
    else:
        emb = jnp.concatenate(
            (jnp.take(prepped["emb_word"], x, axis=0),
             jnp.take(prepped["emb_bigram"], x, axis=0),
             jnp.take(prepped["emb_trigram"], x, axis=0)), axis=-1)
    pooled = jnp.mean(emb.astype(jnp.float32), axis=1)                 # f32 accumulate
    pooled = pooled.astype(jnp.bfloat16)                               # (B, D3) bf16
    # TODO(synk): dropout is identity here (eval-mode semantics); no dropout RNG.

    B = pooled.shape[0]

    if B < small_batch_xla_threshold:
        # Tiny-batch fallback: Pallas launch overhead dominates below ~64 rows.
        o = jnp.dot(pooled, w_eff, preferred_element_type=jnp.float32) + b_eff
        return jnp.maximum(o, 0.0)[:, :C]

    # Batch tile: as large as reasonable (amortize ~0.35us/step overhead), but
    # keep >= 2 grid steps when possible so "parallel" shards over both TCs (v7x).
    TB = min(1024, max(8, _round_up(pl.cdiv(B, 2), 8)))
    grid = (pl.cdiv(B, TB),)

    out = pl.pallas_call(
        fasttext_fused_mlp_kernel,
        out_shape=jax.ShapeDtypeStruct((B, Cp), jnp.float32),
        grid=grid,
        in_specs=[
            # activations, tiled over batch; last dim = full 3E (no padding copy)
            pl.BlockSpec((TB, D3), lambda i: (i, 0)),
            pl.BlockSpec((D3, Cp), lambda i: (0, 0)),    # fused weight, VMEM-resident
            pl.BlockSpec((1, Cp), lambda i: (0, 0)),     # fused bias
        ],
        out_specs=pl.BlockSpec((TB, Cp), lambda i: (i, 0)),
        compiler_params=pltpu.CompilerParams(
            dimension_semantics=("parallel",),           # batch axis -> dual-TC on v7x
            vmem_limit_bytes=32 * 1024 * 1024,           # safe on v5e/v6e/v7x at TB<=1024
        ),
    )(pooled, w_eff, b_eff)
    return out[:, :C]


# ---------------------------------------------------------------------------
# Param init (matches PyTorch defaults) and a pure-f32 reference for checking
# ---------------------------------------------------------------------------
def init_params(key, vocab_size, ngram_vocab_size, embedding_dim, hidden_size, class_num):
    k = jax.random.split(key, 8)
    # nn.Embedding default init: N(0, 1)
    emb_word = jax.random.normal(k[0], (vocab_size, embedding_dim), jnp.float32)
    emb_bigram = jax.random.normal(k[1], (ngram_vocab_size, embedding_dim), jnp.float32)
    emb_trigram = jax.random.normal(k[2], (ngram_vocab_size, embedding_dim), jnp.float32)
    # padding_idx = ngram_vocab_size - 1 -> zero row (bigram/trigram only)
    emb_bigram = emb_bigram.at[ngram_vocab_size - 1].set(0.0)
    emb_trigram = emb_trigram.at[ngram_vocab_size - 1].set(0.0)

    # nn.Linear default init: U(-1/sqrt(fan_in), 1/sqrt(fan_in)); stored as (in, out)
    in1 = embedding_dim * 3
    lim1 = 1.0 / jnp.sqrt(jnp.float32(in1))
    w1 = jax.random.uniform(k[3], (in1, hidden_size), jnp.float32, -lim1, lim1)
    b1 = jax.random.uniform(k[4], (1, hidden_size), jnp.float32, -lim1, lim1)

    lim2 = 1.0 / jnp.sqrt(jnp.float32(hidden_size))
    w2 = jax.random.uniform(k[5], (hidden_size, class_num), jnp.float32, -lim2, lim2)
    b2 = jax.random.uniform(k[6], (1, class_num), jnp.float32, -lim2, lim2)

    return {
        "emb_word": emb_word,
        "emb_bigram": emb_bigram,
        "emb_trigram": emb_trigram,
        "w1": w1,
        "b1": b1,
        "w2": w2,
        "b2": b2,
    }


def fasttext_reference(x, params):
    """Pure-f32 XLA reference (matches the PyTorch forward)."""
    emb = jnp.concatenate(
        (jnp.take(params["emb_word"], x, axis=0),
         jnp.take(params["emb_bigram"], x, axis=0),
         jnp.take(params["emb_trigram"], x, axis=0)), axis=-1)
    pooled = jnp.mean(emb, axis=1)
    h = pooled @ params["w1"] + params["b1"]
    o = h @ params["w2"] + params["b2"]
    return jnp.maximum(o, 0.0)


if __name__ == "__main__":
    # Small config consistent with the module's __init__
    vocab_size = 50
    ngram_vocab_size = 50
    embedding_dim = 32
    hidden_size = 32
    class_num = 4
    batch = 2
    seq_len = 8

    key = jax.random.PRNGKey(0)
    kp, kx = jax.random.split(key)
    params = init_params(kp, vocab_size, ngram_vocab_size,
                         embedding_dim, hidden_size, class_num)
    prepped = prepare_params(params)          # one-time constant prep

    x = jax.random.randint(kx, (batch, seq_len), 0, vocab_size, dtype=jnp.int32)
    # make sure the padding index is exercised
    x = x.at[0, 0].set(ngram_vocab_size - 1)

    out = fasttext_forward(x, prepped)        # Pallas-kernel path
    out = jax.block_until_ready(out)

    ref = fasttext_reference(x, params)
    assert out.shape == (batch, class_num)
    assert out.dtype == jnp.float32
    assert bool(jnp.all(out >= 0.0))                       # ReLU output
    assert bool(jnp.all(jnp.isfinite(out)))
    max_err = float(jnp.max(jnp.abs(out - ref)))
    assert max_err < 5e-2, f"mismatch vs f32 reference: {max_err}"
    print("KERNEL_OK")
</pallas_src>

<mosaic_0001>
module attributes {stable_mosaic.version = 11 : i64} {
  func.func @fasttext_fused_mlp_kernel(%arg0: i32, %arg1: memref<8x96xbf16, #tpu.memory_space<vmem>>, %arg2: memref<96x128xbf16, #tpu.memory_space<vmem>>, %arg3: memref<1x128xf32, #tpu.memory_space<vmem>>, %arg4: memref<8x128xf32, #tpu.memory_space<vmem>>) attributes {dimension_semantics = [#tpu.dimension_semantics<parallel>], iteration_bounds = array<i64: 1>, scalar_prefetch = 0 : i64, scratch_operands = 0 : i64, tpu.core_type = #tpu.core_type<tc>, window_params = [{transform_indices = @transform_0, window_bounds = array<i64: 8, 96>}, {pipeline_mode = #tpu.pipeline_mode<synchronous>, transform_indices = @transform_1, window_bounds = array<i64: 96, 128>}, {pipeline_mode = #tpu.pipeline_mode<synchronous>, transform_indices = @transform_2, window_bounds = array<i64: 1, 128>}, {transform_indices = @transform_3, window_bounds = array<i64: 8, 128>}]} {
    %c0 = arith.constant 0 : index
    %c0_0 = arith.constant 0 : index
    %0 = vector.load %arg1[%c0, %c0_0] : memref<8x96xbf16, #tpu.memory_space<vmem>>, vector<8x96xbf16>
    %c0_1 = arith.constant 0 : index
    %c0_2 = arith.constant 0 : index
    %1 = vector.load %arg2[%c0_1, %c0_2] : memref<96x128xbf16, #tpu.memory_space<vmem>>, vector<96x128xbf16>
    %cst = arith.constant dense<0.000000e+00> : vector<8x128xf32>
    %2 = tpu.matmul %0, %1, %cst {dimension_numbers = #tpu.dot_dimension_numbers<[1], [0], [0], [1], [0, 0, 1, 1], [], []>} : vector<8x96xbf16>, vector<96x128xbf16>, vector<8x128xf32> -> vector<8x128xf32>
    %c0_3 = arith.constant 0 : index
    %c0_4 = arith.constant 0 : index
    %3 = vector.load %arg3[%c0_3, %c0_4] : memref<1x128xf32, #tpu.memory_space<vmem>>, vector<1x128xf32>
    %4 = vector.broadcast %3 : vector<1x128xf32> to vector<8x128xf32>
    %5 = arith.addf %2, %4 : vector<8x128xf32>
    %cst_5 = arith.constant 0.000000e+00 : f32
    %6 = vector.broadcast %cst_5 : f32 to vector<8x128xf32>
    %7 = arith.maximumf %5, %6 : vector<8x128xf32>
    %c0_6 = arith.constant 0 : index
    %c0_7 = arith.constant 0 : index
    %8 = vector.load %arg4[%c0_6, %c0_7] : memref<8x128xf32, #tpu.memory_space<vmem>>, vector<8x128xf32>
    tpu.vector_store %arg4[%c0_6, %c0_7], %7 {strides = array<i32>} : memref<8x128xf32, #tpu.memory_space<vmem>>, vector<8x128xf32>,
    return
  }
  func.func @transform_0(%arg0: i32) -> (i32, i32) {
    %c0_i32 = arith.constant 0 : i32
    %c0_i32_0 = arith.constant 0 : i32
    return %arg0, %c0_i32 : i32, i32
  }
  func.func @transform_1(%arg0: i32) -> (i32, i32) {
    %c0_i32 = arith.constant 0 : i32
    %c0_i32_0 = arith.constant 0 : i32
    %c0_i32_1 = arith.constant 0 : i32
    return %c0_i32, %c0_i32_0 : i32, i32
  }
  func.func @transform_2(%arg0: i32) -> (i32, i32) {
    %c0_i32 = arith.constant 0 : i32
    %c0_i32_0 = arith.constant 0 : i32
    %c0_i32_1 = arith.constant 0 : i32
    return %c0_i32, %c0_i32_0 : i32, i32
  }
  func.func @transform_3(%arg0: i32) -> (i32, i32) {
    %c0_i32 = arith.constant 0 : i32
    %c0_i32_0 = arith.constant 0 : i32
    return %arg0, %c0_i32 : i32, i32
  }
}

</mosaic_0001>

<bundles_post_ra>
// kernel: tpu_custom_call.1
= control target key start
LH: loop header
LB: loop body
LE: loop exit
PB: predicated region body
PF: predicated region fallthrough
CT: control target
= control target key end

     0   :  { %8 = vsyncpa [#allocation3], 0  ;;  %s387_s0 = inlined_call_operand.hbm [shape: bf16[2,96], index: 0, kind: input, shape index: {}]   ;;  %s388_s1 = inlined_call_operand.hbm [shape: bf16[96,128], index: 1, kind: input, shape index: {}]   ;;  %s389_s2 = inlined_call_operand.vmem [shape: f32[1,128], index: 2, kind: input, shape index: {}]   ;;  %s390_s3 = inlined_call_operand.hbm [shape: f32[2,128], index: 3, kind: output, shape index: {}]  }
   0x1   :  { %9 = vsyncpa [#allocation6], 0 }
   0x2   :  { %10 = vsyncpa [#allocation4], 0 }
   0x3   :  { %15 = vsyncadd [#allocation3], 48  ;;  %s316_s12 = smov [#allocation2]   ;;  %s244_s16 = scalar_lea.hbm %s387_s0, 16 }
   0x4   :  { %s16_s13 = sshll.u32 %s316_s12, 4  ;;  %p245_p0 = scmp.ne.s32.totalorder %s387_s0, %s244_s16  ;;  %s17_s13 = int_to_ptr.vmem [resolvable:$true] %s16_s13 }
   0x5   :  { %p248_p1 = scmp.lt.u32.totalorder %s244_s16, %s387_s0 }
   0x7   :  { %p250_p2 = pnand %p248_p1, %p245_p0 }
   0x9   :  { %253 = shalt.err (!%p250_p2)
}
   0xa   :  { %s254_s21 = scalar_lea.vmem %s17_s13, 16  ;;  %s258_s22 = scalar_lea.vmem %s17_s13, 64 }
   0xb   :  { %p255_p3 = scmp.ne.s32.totalorder %s17_s13, %s254_s21  ;;  %p259_p4 = scmp.lt.s32.totalorder %s17_s13, %s17_s13 }
   0xc   :  { %p260_p5 = scmp.lt.s32.totalorder %s258_s22, %s254_s21 }
   0xe   :  { %p261_p6 = por %p260_p5, %p259_p4 }
  0x10   :  { %p262_p7 = pnand %p261_p6, %p255_p3 }
  0x12   :  { %265 = shalt.err (!%p262_p7)
}
  0x13   :  { %s317_s23 = smov 16   ;;  %s318_s24 = smov 1  }
  0x14   :  { %22 = dma.hbm_to_vmem [thread:$0]  %s387_s0, 16, %s17_s13, [#allocation3], %s317_s23, %s317_s23, %s318_s24  }
  0x15   :  { %s319_s27 = smov [#allocation5]   ;;  %s266_s4 = scalar_lea.hbm %s388_s1, 768 }
  0x16   :  { %s28_s28 = sshll.u32 %s319_s27, 4  ;;  %p267_p8 = scmp.ne.s32.totalorder %s388_s1, %s266_s4  ;;  %s29_s28 = int_to_ptr.vmem [resolvable:$true] %s28_s28 }
  0x17   :  { %p270_p9 = scmp.lt.u32.totalorder %s266_s4, %s388_s1 }
  0x19   :  { %p272_p10 = pnand %p270_p9, %p267_p8 }
  0x1b   :  { %275 = shalt.err (!%p272_p10)
}
  0x1c   :  { %s276_s9 = scalar_lea.vmem %s29_s28, 768  ;;  %p281_p12 = scmp.lt.s32.totalorder %s29_s28, %s29_s28 }
  0x1d   :  { %p277_p11 = scmp.ne.s32.totalorder %s29_s28, %s276_s9  ;;  %p282_p13 = scmp.lt.s32.totalorder %s276_s9, %s276_s9 }
  0x1f   :  { %p283_p0 = por %p282_p13, %p281_p12 }
  0x21   :  { %p284_p1 = pnand %p283_p0, %p277_p11 }
  0x23   :  { %287 = shalt.err (!%p284_p1)
}
  0x24   :  { %s320_s0 = smov 64   ;;  %s321_s10 = smov 4  }
  0x25   :  { %34 = dma.hbm_to_vmem [thread:$0]  %s388_s1, 768, %s29_s28, [#allocation6], %s320_s0, %s320_s0, %s321_s10  }
  0x26   :  { %310 = dma.done.wait [#allocation3], 64  }
  0x27   :  { %311 = vsyncadd [#allocation3], 4294967232 }
  0x28   :  { %312 = dma.done.wait [#allocation6], 768  }
  0x29   :  { %313 = vsyncadd [#allocation6], 4294966528  ;;  %v322_v0 = vmov 0.0   ;;  %vm323_vm0 = vmmov 0   ;;  %v238_v1 = vld [vmem:[#allocation5] sm:$0xff]   ;;  %v76_v4 = vlaneseq  ;;  %v239_v5 = vld [vmem:[#allocation5 + $0x8] sm:$0xff]  }
  0x2a   :  { %210 = vmatprep.subr.bf16.mxu0 %v322_v0  ;;  %222 = vmatprep.mubr.msk.bf16.mxu0 %vm323_vm0, %v322_v0  ;;  %v324_v2 = vmov 1966171168   ;;  %v240_v6 = vld [vmem:[#allocation5 + $0x10] sm:$0xff]   ;;  %v44_v9 = vld [vmem:[#allocation2] sm:$0x1]  ;;  %v242_v19 = vld [vmem:[#allocation5 + $0x20] sm:$0xff]  }
  0x2b   :  { %v74_v3 = vunpack.c.l.s4 %v324_v2  ;;  %211 = vmatpush3.bf16.msra.mxu0 %v238_v1  ;;  %v77_v8 = vshrl.u32 %v76_v4, 7  ;;  %v45_v10 = vld [vmem:[#allocation2 + $0x1] sm:$0x1]  ;;  %v46_v11 = vld [vmem:[#allocation2 + $0x2] sm:$0x1]  ;;  %v243_v21 = vld [vmem:[#allocation5 + $0x28] sm:$0xff]  }
  0x2c   :  { %212 = vmatprep.subr.bf16.mxu0 %v322_v0  ;;  %v47_v12 = vld [vmem:[#allocation2 + $0x3] sm:$0x1]  ;;  %v71_v13 = vcombine.low %v44_v9, %v45_v10  ;;  %vm131_vm1 = vcmask 785408   ;;  %v195_v23 = vld [vmem:[%s389_s2] ss:$0 sm:$0xff] }
  0x2d   :  { %v75_v7 = vunpack.c.0.s8 %v74_v3  ;;  %v72_v14 = vcombine.low %v46_v11, %v47_v12  ;;  %v241_v16 = vld [vmem:[#allocation5 + $0x18] sm:$0xff]  }
  0x2f   :  { %213 = vmatpush3.bf16.msra.mxu0 %v239_v5  ;;  %v78_v15 = vsub.s32 %v75_v7, %v77_v8 }
  0x30   :  { %214 = vmatprep.subr.bf16.mxu0 %v322_v0 }
  0x31   :  { %v79_v17 = vrot.slane %v71_v13, %v78_v15  ;;  %v86_v18 = vrot.slane %v72_v14, %v78_v15 }
  0x33   :  { %215 = vmatpush3.bf16.msra.mxu0 %v240_v6  ;;  %v87_v20 = vcombine.low %v79_v17, %v86_v18 }
  0x34   :  { %216 = vmatprep.subr.bf16.mxu0 %v322_v0 }
  0x35   :  { %v94_v22 = vrot.slane %v87_v20, %v78_v15 }
  0x37   :  { %217 = vmatpush3.bf16.msra.mxu0 %v241_v16 }
  0x38   :  { %218 = vmatprep.subr.bf16.mxu0 %v322_v0 }
  0x3b   :  { %219 = vmatpush3.bf16.msra.mxu0 %v242_v19 }
  0x3c   :  { %220 = vmatprep.subr.bf16.mxu0 %v322_v0 }
  0x3f   :  { %221 = vmatpush3.bf16.msra.mxu0 %v243_v21 }
  0x42   :  { %223 = vmatmul.mubr.msk.bf16.vlgmr.msra.gmra.mrb[0].mxu0 %vm131_vm1, %v94_v22 }
 0x115   :  { %v169_v24 = vpop.f32.mrb[0].mxu0 }
 0x116   :  { %v170_v25 = vadd.f32 %v195_v23, %v169_v24  ;;  %v224_v26 = vpop.f32.mrb[1].mxu0 }
 0x117   :  { %v172_v27 = vpop.f32.mrb[2].mxu0 }
 0x118   :  { %v175_v28 = vmax.f32 %v170_v25, 0.0  ;;  %v225_v29 = vpop.f32.mrb[3].mxu0 }
 0x11a   :  { %176 = vst [vmem:[#allocation7] sm:$0xff] %v175_v28 }
 0x11b   :  { %181 = vsyncadd [#allocation4], 96  ;;  %s325_s14 = smov [#allocation7]  }
 0x11c   :  { %s182_s15 = sshll.u32 %s325_s14, 4  ;;  %s183_s15 = int_to_ptr.vmem [resolvable:$true] %s182_s15 }
 0x11d   :  { %s288_s16 = scalar_lea.vmem %s183_s15, 32  ;;  %s292_s17 = scalar_lea.vmem %s183_s15, 128 }
 0x11e   :  { %p289_p2 = scmp.ne.s32.totalorder %s183_s15, %s288_s16  ;;  %p293_p3 = scmp.lt.s32.totalorder %s183_s15, %s183_s15 }
 0x11f   :  { %p294_p4 = scmp.lt.s32.totalorder %s292_s17, %s288_s16 }
 0x121   :  { %p295_p5 = por %p294_p4, %p293_p3 }
 0x123   :  { %p296_p6 = pnand %p295_p5, %p289_p2 }
 0x125   :  { %299 = shalt.err (!%p296_p6)
}
 0x126   :  { %s300_s19 = scalar_lea.hbm %s390_s3, 32 }
 0x127   :  { %p301_p7 = scmp.ne.s32.totalorder %s390_s3, %s300_s19  ;;  %p304_p8 = scmp.lt.u32.totalorder %s300_s19, %s390_s3 }
 0x129   :  { %p306_p9 = pnand %p304_p8, %p301_p7 }
 0x12b   :  { %309 = shalt.err (!%p306_p9)
}
 0x12c   :  { %s326_s24 = smov 32   ;;  %s327_s25 = smov 2  }
 0x12d   :  { %188 = dma.vmem_to_hbm [thread:$0]  %s183_s15, 32, %s390_s3, [#allocation4], %s326_s24, %s326_s24, %s327_s25  }
 0x12e   :  { %314 = dma.done.wait [#allocation4], 128  }
 0x12f   :  { %315 = vsyncadd [#allocation4], 4294967168 }
 0x130   :  { %192 = vsyncpa [#allocation3], 1 }
 0x131   :  { %193 = vsyncpa [#allocation6], 1 }
 0x132   :  { %194 = vsyncpa [#allocation4], 1 }

</bundles_post_ra>
